<compile_context>
chip_gen: v7x
topology: tpu7x:2x2x1
jax: 0.10.0
libtpu: 0.0.40
codegen_flags: <defaults>
</compile_context>

<pallas_src>
import functools

import jax
import jax.numpy as jnp
from jax.experimental import pallas as pl
from jax.experimental.pallas import tpu as pltpu


def _round_up(x, m):
    return (x + m - 1) // m * m


def _layout(num_inputs, hidden1, hidden2, num_outputs):
    """Static row/column layout of the packed parameter buffer."""
    two_n = 2 * num_inputs
    lanes = _round_up(max(2 * hidden1, 2 * hidden2, 1 + num_outputs, 128), 128)
    r_b1 = _round_up(two_n, 8)          # conv-bias-folded layer-1 bias row
    r_w2 = r_b1 + 8                     # block-diagonal layer-2 weights (lanes x lanes)
    r_w3 = r_w2 + lanes                 # block-diagonal layer-3 weights (lanes x lanes)
    r_b3 = r_w3 + lanes                 # layer-3 bias row
    rows = r_b3 + 8
    return dict(two_n=two_n, lanes=lanes, rows=rows,
                r_b1=r_b1, r_w2=r_w2, r_w3=r_w3, r_b3=r_b3)


def _a2c_kernel(x_ref, p_ref, out_ref, *, two_n, lanes, r_b1, r_w2, r_w3, r_b3):
    x = x_ref[...]                                    # (1, 2N) interleaved (pos0_ch0, pos0_ch1, ...)

    w1 = p_ref[0:two_n, :]                            # (2N, L) conv-fused L1: critic cols | actor cols
    b1 = p_ref[r_b1:r_b1 + 1, :]                      # (1, L)  conv bias folded through L1
    w2 = p_ref[r_w2:r_w2 + lanes, :]                  # (L, L)  block-diagonal critic/actor L2
    w3 = p_ref[r_w3:r_w3 + lanes, :]                  # (L, L)  block-diagonal critic/actor L3
    b3 = p_ref[r_b3:r_b3 + 1, :]                      # (1, L)  [b3_critic, b3_actor..., 0...]

    h1 = jnp.maximum(jnp.dot(x, w1, preferred_element_type=jnp.float32) + b1, 0.0)   # (1, L)
    h2 = jnp.maximum(jnp.dot(h1, w2, preferred_element_type=jnp.float32), 0.0)       # (1, L)
    out_ref[...] = jnp.dot(h2, w3, preferred_element_type=jnp.float32) + b3          # (1, L)


def init_raw_params(key, num_inputs, hidden1, hidden2, num_outputs):
    """PyTorch-native parameter shapes."""
    ks = jax.random.split(key, 12)
    s = 0.05
    rnd = lambda k, shape: s * jax.random.normal(k, shape, jnp.float32)
    return {
        # critic
        "cw_c": rnd(ks[0], (2,)),                       # Conv1d(2,1,1).weight squeezed
        "cb_c": rnd(ks[1], (1,)),                       # Conv1d bias
        "w1_c": rnd(ks[2], (hidden1, num_inputs)),      # Linear(N, H1, bias=False).weight
        "w2_c": rnd(ks[3], (hidden2, hidden1)),         # Linear(H1, H2, bias=False).weight
        "w3_c": rnd(ks[4], (1, hidden2)),               # Linear(H2, 1).weight
        "b3_c": rnd(ks[5], (1,)),                       # Linear(H2, 1).bias
        # actor
        "cw_a": rnd(ks[6], (2,)),
        "cb_a": rnd(ks[7], (1,)),
        "w1_a": rnd(ks[8], (hidden1, num_inputs)),
        "w2_a": rnd(ks[9], (hidden2, hidden1)),
        "w3_a": rnd(ks[10], (num_outputs, hidden2)),
        "b3_a": rnd(ks[11], (num_outputs,)),
    }


def pack_params(raw, num_inputs, hidden1, hidden2, num_outputs):
    """One-time host-side pack: fuse conv into L1, block-diagonal critic/actor, one buffer."""
    N, H1, H2, O = num_inputs, hidden1, hidden2, num_outputs
    lay = _layout(N, H1, H2, O)
    L = lay["lanes"]

    def fuse_conv_l1(conv_w, conv_b, w1):
        # v[n] = cw0*x[2n] + cw1*x[2n+1] + cb; L1 has no bias, so the conv folds exactly.
        w1_t = w1.T                                                       # (N, H1)
        w1f = (w1_t[:, None, :] * conv_w[None, :, None]).reshape(2 * N, w1.shape[0])
        b1 = conv_b[0] * jnp.sum(w1_t, axis=0)                            # (H1,)
        return w1f, b1

    w1f_c, b1_c = fuse_conv_l1(raw["cw_c"], raw["cb_c"], raw["w1_c"])
    w1f_a, b1_a = fuse_conv_l1(raw["cw_a"], raw["cb_a"], raw["w1_a"])

    p = jnp.zeros((lay["rows"], L), jnp.float32)
    # layer 1 (shared x): critic -> cols [0, H1), actor -> cols [H1, 2H1)
    p = p.at[0:2 * N, 0:H1].set(w1f_c)
    p = p.at[0:2 * N, H1:2 * H1].set(w1f_a)
    p = p.at[lay["r_b1"], 0:H1].set(b1_c)
    p = p.at[lay["r_b1"], H1:2 * H1].set(b1_a)
    # layer 2: block-diagonal
    p = p.at[lay["r_w2"]:lay["r_w2"] + H1, 0:H2].set(raw["w2_c"].T)
    p = p.at[lay["r_w2"] + H1:lay["r_w2"] + 2 * H1, H2:2 * H2].set(raw["w2_a"].T)
    # layer 3: value -> lane 0, actor logits -> lanes 1..O
    p = p.at[lay["r_w3"]:lay["r_w3"] + H2, 0:1].set(raw["w3_c"].T)
    p = p.at[lay["r_w3"] + H2:lay["r_w3"] + 2 * H2, 1:1 + O].set(raw["w3_a"].T)
    p = p.at[lay["r_b3"], 0].set(raw["b3_c"][0])
    p = p.at[lay["r_b3"], 1:1 + O].set(raw["b3_a"])
    return {"packed": p, "layout": lay, "num_outputs": O}


def a2c_forward(x, params):
    """x: flat state with 2*num_inputs elements (exactly what torch reshape(-1,2,1) expects)."""
    lay = params["layout"]
    num_outputs = params["num_outputs"]

    kernel = functools.partial(
        _a2c_kernel,
        two_n=lay["two_n"], lanes=lay["lanes"],
        r_b1=lay["r_b1"], r_w2=lay["r_w2"], r_w3=lay["r_w3"], r_b3=lay["r_b3"])

    vmem = pl.BlockSpec(memory_space=pltpu.MemorySpace.VMEM)
    out = pl.pallas_call(
        kernel,
        out_shape=jax.ShapeDtypeStruct((1, lay["lanes"]), jnp.float32),
        in_specs=[vmem, vmem],          # x + one packed parameter buffer -> 2 input DMAs total
        out_specs=vmem,                 # single lane-dense output
    )(x.reshape(1, lay["two_n"]).astype(jnp.float32), params["packed"])

    value = out[0, 0:1]                  # (1,)
    probs = out[0, 1:1 + num_outputs]    # (O,) raw actor logits (softmax lives in `remember`)
    return probs, value


def _reference(x, raw, num_inputs):
    """Pure-JAX reference mirroring the torch graph with the un-fused parameters."""
    x3 = x.reshape(num_inputs, 2)                         # (N, 2, 1) with length-1 squeezed

    def branch(cw, cb, w1, w2, w3, b3):
        v = x3 @ cw + cb[0]                               # Conv1d(2,1,1) + Flatten -> (N,)
        h1 = jnp.maximum(v @ w1.T, 0.0)
        h2 = jnp.maximum(h1 @ w2.T, 0.0)
        return h2 @ w3.T + b3

    value = branch(raw["cw_c"], raw["cb_c"], raw["w1_c"], raw["w2_c"], raw["w3_c"], raw["b3_c"])
    probs = branch(raw["cw_a"], raw["cb_a"], raw["w1_a"], raw["w2_a"], raw["w3_a"], raw["b3_a"])
    return probs, value


if __name__ == "__main__":
    # Small shapes consistent with the module: num_inputs=32, layer_size=[64, 32], num_outputs=8.
    num_inputs, hidden1, hidden2, num_outputs = 32, 64, 32, 8

    key = jax.random.PRNGKey(0)
    kp, kx = jax.random.split(key)
    raw = init_raw_params(kp, num_inputs, hidden1, hidden2, num_outputs)
    params = pack_params(raw, num_inputs, hidden1, hidden2, num_outputs)

    # Flat state vector with 2*num_inputs entries (torch reshapes it to (N, 2, 1)).
    x = jax.random.normal(kx, (2 * num_inputs,), jnp.float32)

    probs, value = a2c_forward(x, params)
    jax.block_until_ready((probs, value))

    ref_probs, ref_value = _reference(x, raw, num_inputs)
    assert probs.shape == (num_outputs,) and value.shape == (1,)
    assert bool(jnp.allclose(probs, ref_probs, atol=1e-5, rtol=1e-5))
    assert bool(jnp.allclose(value, ref_value, atol=1e-5, rtol=1e-5))

    # TODO(synk): remember/train/compute_returns (Categorical sampling, Python-list replay,
    # optimizer step) are host-side RL bookkeeping and are not part of the forward kernel.
    print("KERNEL_OK")
</pallas_src>

<mosaic_0001>
module attributes {stable_mosaic.version = 11 : i64} {
  func.func @_a2c_kernel(%arg0: memref<1x64xf32, #tpu.memory_space<vmem>>, %arg1: memref<336x128xf32, #tpu.memory_space<vmem>>, %arg2: memref<1x128xf32, #tpu.memory_space<vmem>>) attributes {dimension_semantics = [], scalar_prefetch = 0 : i64, scratch_operands = 0 : i64, tpu.core_type = #tpu.core_type<tc>} {
    %c0 = arith.constant 0 : index
    %c0_0 = arith.constant 0 : index
    %0 = vector.load %arg0[%c0, %c0_0] : memref<1x64xf32, #tpu.memory_space<vmem>>, vector<1x64xf32>
    %c0_1 = arith.constant 0 : index
    %c0_2 = arith.constant 0 : index
    %1 = vector.load %arg1[%c0_1, %c0_2] : memref<336x128xf32, #tpu.memory_space<vmem>>, vector<64x128xf32>
    %c64 = arith.constant 64 : index
    %c0_3 = arith.constant 0 : index
    %2 = vector.load %arg1[%c64, %c0_3] : memref<336x128xf32, #tpu.memory_space<vmem>>, vector<1x128xf32>
    %c72 = arith.constant 72 : index
    %c0_4 = arith.constant 0 : index
    %3 = vector.load %arg1[%c72, %c0_4] : memref<336x128xf32, #tpu.memory_space<vmem>>, vector<128x128xf32>
    %c200 = arith.constant 200 : index
    %c0_5 = arith.constant 0 : index
    %4 = vector.load %arg1[%c200, %c0_5] : memref<336x128xf32, #tpu.memory_space<vmem>>, vector<128x128xf32>
    %c328 = arith.constant 328 : index
    %c0_6 = arith.constant 0 : index
    %5 = vector.load %arg1[%c328, %c0_6] : memref<336x128xf32, #tpu.memory_space<vmem>>, vector<1x128xf32>
    %cst = arith.constant dense<0.000000e+00> : vector<1x128xf32>
    %6 = tpu.matmul %0, %1, %cst {dimension_numbers = #tpu.dot_dimension_numbers<[1], [0], [0], [1], [0, 0, 1, 1], [], []>} : vector<1x64xf32>, vector<64x128xf32>, vector<1x128xf32> -> vector<1x128xf32>
    %7 = arith.addf %6, %2 : vector<1x128xf32>
    %cst_7 = arith.constant 0.000000e+00 : f32
    %8 = vector.broadcast %cst_7 : f32 to vector<1x128xf32>
    %9 = arith.maximumf %7, %8 : vector<1x128xf32>
    %cst_8 = arith.constant dense<0.000000e+00> : vector<1x128xf32>
    %10 = tpu.matmul %9, %3, %cst_8 {dimension_numbers = #tpu.dot_dimension_numbers<[1], [0], [0], [1], [0, 0, 1, 1], [], []>} : vector<1x128xf32>, vector<128x128xf32>, vector<1x128xf32> -> vector<1x128xf32>
    %cst_9 = arith.constant 0.000000e+00 : f32
    %11 = vector.broadcast %cst_9 : f32 to vector<1x128xf32>
    %12 = arith.maximumf %10, %11 : vector<1x128xf32>
    %cst_10 = arith.constant dense<0.000000e+00> : vector<1x128xf32>
    %13 = tpu.matmul %12, %4, %cst_10 {dimension_numbers = #tpu.dot_dimension_numbers<[1], [0], [0], [1], [0, 0, 1, 1], [], []>} : vector<1x128xf32>, vector<128x128xf32>, vector<1x128xf32> -> vector<1x128xf32>
    %14 = arith.addf %13, %5 : vector<1x128xf32>
    %c0_11 = arith.constant 0 : index
    %c0_12 = arith.constant 0 : index
    %15 = vector.load %arg2[%c0_11, %c0_12] : memref<1x128xf32, #tpu.memory_space<vmem>>, vector<1x128xf32>
    tpu.vector_store %arg2[%c0_11, %c0_12], %14 {strides = array<i32>} : memref<1x128xf32, #tpu.memory_space<vmem>>, vector<1x128xf32>,
    return
  }
}

</mosaic_0001>

<bundles_post_ra>
// kernel: tpu_custom_call.1
= control target key start
LH: loop header
LB: loop body
LE: loop exit
PB: predicated region body
PF: predicated region fallthrough
CT: control target
= control target key end

     0   :  { %7 = vsyncpa [#allocation3], 0  ;;  %s676_s0 = inlined_call_operand.hbm [shape: f32[1,64], index: 0, kind: input, shape index: {}]   ;;  %s677_s1 = inlined_call_operand.hbm [shape: f32[336,128], index: 1, kind: input, shape index: {}]   ;;  %s678_s2 = inlined_call_operand.hbm [shape: f32[1,128], index: 2, kind: output, shape index: {}]  }
   0x1   :  { %8 = vsyncpa [#allocation6], 0 }
   0x2   :  { %9 = vsyncpa [#allocation4], 0  ;;  %s587_s9 = smov [#allocation2]   ;;  %s588_s11 = smov [#allocation5]  }
   0x3   :  { %s16_s10 = sshll.u32 %s587_s9, 4  ;;  %s25_s12 = sshll.u32 %s588_s11, 4  ;;  %s17_s10 = int_to_ptr.vmem [resolvable:$true] %s16_s10  ;;  %s610_s12 = int_to_ptr.vmem [resolvable:$true] %s25_s12 }
   0x4   :  { %s515_s15 = scalar_lea.hbm %s676_s0, 16 }
   0x5   :  { %p516_p0 = scmp.ne.s32.totalorder %s676_s0, %s515_s15  ;;  %p519_p1 = scmp.lt.u32.totalorder %s515_s15, %s676_s0 }
   0x7   :  { %p521_p2 = pnand %p519_p1, %p516_p0 }
   0x9   :  { %524 = shalt.err (!%p521_p2)
}
   0xa   :  { %s525_s20 = scalar_lea.vmem %s17_s10, 16  ;;  %s529_s21 = scalar_lea.vmem %s17_s10, 32 }
   0xb   :  { %p526_p3 = scmp.ne.s32.totalorder %s17_s10, %s525_s20  ;;  %p530_p4 = scmp.lt.s32.totalorder %s17_s10, %s17_s10 }
   0xc   :  { %p531_p5 = scmp.lt.s32.totalorder %s529_s21, %s525_s20 }
   0xe   :  { %p532_p6 = por %p531_p5, %p530_p4 }
  0x10   :  { %p533_p7 = pnand %p532_p6, %p526_p3 }
  0x12   :  { %536 = shalt.err (!%p533_p7)
}
  0x13   :  { %19 = dma.hbm_to_vmem [thread:$0]  %s676_s0, 16, %s17_s10, [#allocation3]  }
  0x14   :  { %s537_s26 = scalar_lea.hbm %s677_s1, 5376 }
  0x15   :  { %p538_p8 = scmp.ne.s32.totalorder %s677_s1, %s537_s26  ;;  %p541_p9 = scmp.lt.u32.totalorder %s537_s26, %s677_s1 }
  0x17   :  { %p543_p10 = pnand %p541_p9, %p538_p8 }
  0x19   :  { %546 = shalt.err (!%p543_p10)
}
  0x1a   :  { %s547_s3 = scalar_lea.vmem %s610_s12, 5376  ;;  %p552_p12 = scmp.lt.s32.totalorder %s610_s12, %s610_s12 }
  0x1b   :  { %p548_p11 = scmp.ne.s32.totalorder %s610_s12, %s547_s3  ;;  %p553_p13 = scmp.lt.s32.totalorder %s547_s3, %s547_s3 }
  0x1d   :  { %p554_p0 = por %p553_p13, %p552_p12 }
  0x1f   :  { %p555_p1 = pnand %p554_p0, %p548_p11 }
  0x21   :  { %558 = shalt.err (!%p555_p1)
}
  0x22   :  { %s589_s0 = smov 128   ;;  %s590_s4 = smov 8  }
  0x23   :  { %31 = dma.hbm_to_vmem [thread:$0]  %s677_s1, 5376, %s610_s12, [#allocation6], %s589_s0, %s589_s0, %s590_s4  }
  0x24   :  { %581 = dma.done.wait [#allocation3], 16  }
  0x25   :  { %582 = vsyncadd [#allocation3], 4294967280 }
  0x26   :  { %583 = dma.done.wait [#allocation6], 5376  }
  0x27   :  { %584 = vsyncadd [#allocation6], 4294961920  ;;  %v591_v0 = vmov 0.0|0.0   ;;  %vm592_vm0 = vmmov 0   ;;  %v593_v1 = vmov 0.0   ;;  %v39_v2 = vld [vmem:[#allocation5] sm:$0xff] }
  0x28   :  { %447 = vmatprep.subr.bf16.mxu0 %v591_v0  ;;  %374 = vmatprep.mubr.msk.f32.mxu0 %vm592_vm0, %v593_v1  ;;  %v40_v3 = vld [vmem:[#allocation5 + $0x8] sm:$0xff]  ;;  %v41_v4 = vld [vmem:[#allocation5 + $0x10] sm:$0xff]  ;;  %v42_v6 = vld [vmem:[#allocation5 + $0x18] sm:$0xff]  ;;  %vm81_vm1 = vcmask 523264   ;;  %s594_s1 = smov [#allocation7]  }
  0x29   :  { %459 = vmatprep.subr.bf16.mxu1 %v591_v0  ;;  %409 = vmatprep.mubr.msk.f32.mxu1 %vm592_vm0, %v593_v1  ;;  %v448_v5 = vpack.c.bf16 %v40_v3, %v39_v2  ;;  %v451_v7 = vpack.c.bf16 %v42_v6, %v41_v4  ;;  %v48_v8 = vld [vmem:[#allocation5 + $0x48] sm:$0xff]  ;;  %v49_v9 = vld [vmem:[#allocation5 + $0x50] sm:$0xff]  ;;  %v50_v10 = vld [vmem:[#allocation5 + $0x58] sm:$0xff]  ;;  %s304_s7 = sshll.u32 %s594_s1, 4  ;;  %s305_s7 = int_to_ptr.vmem [resolvable:$true] %s304_s7 }
  0x2a   :  { %v43_v11 = vld [vmem:[#allocation5 + $0x20] sm:$0xff]  ;;  %v44_v12 = vld [vmem:[#allocation5 + $0x28] sm:$0xff]  ;;  %v460_v13 = vpack.c.bf16 %v49_v9, %v48_v8  ;;  %v53_v18 = vld [vmem:[#allocation5 + $0x70] sm:$0xff]  ;;  %s559_s8 = scalar_lea.vmem %s305_s7, 16  ;;  %s563_s9 = scalar_lea.vmem %s305_s7, 32 }
  0x2b   :  { %449 = vmatpush3.bf16.msra.mxu0 %v448_v5  ;;  %v51_v14 = vld [vmem:[#allocation5 + $0x60] sm:$0xff]  ;;  %v454_v16 = vpack.c.bf16 %v44_v12, %v43_v11  ;;  %v52_v17 = vld [vmem:[#allocation5 + $0x68] sm:$0xff]  ;;  %v45_v19 = vld [vmem:[#allocation5 + $0x30] sm:$0xff]  ;;  %p560_p2 = scmp.ne.s32.totalorder %s305_s7, %s559_s8  ;;  %p564_p3 = scmp.lt.s32.totalorder %s305_s7, %s305_s7 }
  0x2c   :  { %450 = vmatprep.subr.bf16.mxu0 %v591_v0  ;;  %461 = vmatpush3.bf16.msra.mxu1 %v460_v13  ;;  %v463_v15 = vpack.c.bf16 %v51_v14, %v50_v10  ;;  %v46_v20 = vld [vmem:[#allocation5 + $0x38] sm:$0xff]  ;;  %v466_v21 = vpack.c.bf16 %v53_v18, %v52_v17  ;;  %v55_v24 = vld [vmem:[#allocation5 + $0x80] sm:$0xff]  ;;  %v56_v27 = vld [vmem:[#allocation5 + $0x88] sm:$0xff]  ;;  %p565_p4 = scmp.lt.s32.totalorder %s563_s9, %s559_s8 }
  0x2d   :  { %462 = vmatprep.subr.bf16.mxu1 %v591_v0  ;;  %v457_v22 = vpack.c.bf16 %v46_v20, %v45_v19  ;;  %v54_v23 = vld [vmem:[#allocation5 + $0x78] sm:$0xff]  ;;  %v57_v28 = vld [vmem:[#allocation5 + $0x90] sm:$0xff]  ;;  %v59_v31 = vld [vmem:[#allocation5 + $0xa0] sm:$0xff] }
  0x2e   :  { %v469_v25 = vpack.c.bf16 %v55_v24, %v54_v23  ;;  %v38_v26 = vld [vmem:[#allocation2] sm:$0x1]  ;;  %v472_v29 = vpack.c.bf16 %v57_v28, %v56_v27  ;;  %v60_v33 = vld [vmem:[#allocation5 + $0xa8] sm:$0xff]  ;;  %v61_v34 = vld [vmem:[#allocation5 + $0xb0] sm:$0xff]  ;;  %p566_p5 = por %p565_p4, %p564_p3 }
  0x2f   :  { %452 = vmatpush3.bf16.msra.mxu0 %v451_v7  ;;  %v58_v30 = vld [vmem:[#allocation5 + $0x98] sm:$0xff]  ;;  %v478_v35 = vpack.c.bf16 %v61_v34, %v60_v33  ;;  %v63_v37 = vld [vmem:[#allocation5 + $0xc0] sm:$0xff]  ;;  %v64_v39 = vld [vmem:[#allocation5 + $0xc8] sm:$0xff] }
  0x30   :  { %453 = vmatprep.subr.bf16.mxu0 %v591_v0  ;;  %464 = vmatpush3.bf16.msra.mxu1 %v463_v15  ;;  %v475_v32 = vpack.c.bf16 %v59_v31, %v58_v30  ;;  %v62_v36 = vld [vmem:[#allocation5 + $0xb8] sm:$0xff]  ;;  %v65_v40 = vld [vmem:[#allocation5 + $0xd0] sm:$0xff]  ;;  %v67_v43 = vld [vmem:[#allocation5 + $0xe0] sm:$0xff]  ;;  %p567_p6 = pnand %p566_p5, %p560_p2 }
  0x31   :  { %465 = vmatprep.subr.bf16.mxu1 %v591_v0  ;;  %v481_v38 = vpack.c.bf16 %v63_v37, %v62_v36  ;;  %v66_v41 = vld [vmem:[#allocation5 + $0xd8] sm:$0xff]  ;;  %v484_v42 = vpack.c.bf16 %v65_v40, %v64_v39  ;;  %v68_v45 = vld [vmem:[#allocation5 + $0xe8] sm:$0xff]  ;;  %v69_v46 = vld [vmem:[#allocation5 + $0xf0] sm:$0xff] }
  0x32   :  { %v487_v44 = vpack.c.bf16 %v67_v43, %v66_v41  ;;  %v490_v47 = vpack.c.bf16 %v69_v46, %v68_v45  ;;  %v70_v48 = vld [vmem:[#allocation5 + $0xf8] sm:$0xff]  ;;  %v71_v49 = vld [vmem:[#allocation5 + $0x100] sm:$0xff]  ;;  %v72_v51 = vld [vmem:[#allocation5 + $0x108] sm:$0xff] }
  0x33   :  { %455 = vmatpush3.bf16.msra.mxu0 %v454_v16  ;;  %v493_v50 = vpack.c.bf16 %v71_v49, %v70_v48  ;;  %v73_v52 = vld [vmem:[#allocation5 + $0x110] sm:$0xff]  ;;  %v74_v54 = vld [vmem:[#allocation5 + $0x118] sm:$0xff]  ;;  %v75_v55 = vld [vmem:[#allocation5 + $0x120] sm:$0xff] }
  0x34   :  { %456 = vmatprep.subr.bf16.mxu0 %v591_v0  ;;  %467 = vmatpush3.bf16.msra.mxu1 %v466_v21  ;;  %v496_v53 = vpack.c.bf16 %v73_v52, %v72_v51  ;;  %v499_v56 = vpack.c.bf16 %v75_v55, %v74_v54  ;;  %v76_v57 = vld [vmem:[#allocation5 + $0x128] sm:$0xff]  ;;  %v77_v58 = vld [vmem:[#allocation5 + $0x130] sm:$0xff]  ;;  %v47_v60 = vld [vmem:[#allocation5 + $0x40] sm:$0x1] }
  0x35   :  { %468 = vmatprep.subr.bf16.mxu1 %v591_v0  ;;  %v502_v59 = vpack.c.bf16 %v77_v58, %v76_v57  ;;  %v78_v2 = vld [vmem:[#allocation5 + $0x138] sm:$0xff]  ;;  %v79_v3 = vld [vmem:[#allocation5 + $0x140] sm:$0xff]  ;;  %v80_v8 = vld [vmem:[#allocation5 + $0x148] sm:$0x1] }
  0x36   :  { %v505_v4 = vpack.c.bf16 %v79_v3, %v78_v2 }
  0x37   :  { %458 = vmatpush3.bf16.msra.mxu0 %v457_v22 }
  0x38   :  { %483 = vmatprep.subr.bf16.mxu0 %v591_v0  ;;  %470 = vmatpush3.bf16.msra.mxu1 %v469_v25 }
  0x39   :  { %471 = vmatprep.subr.bf16.mxu1 %v591_v0 }
  0x3a   :  { %375 = vmatmul.mubr.msk.f32.vlgmr.msra.gmra.mrb[0].mxu0 %vm81_vm1, %v38_v26 }
  0x3b   :  { %444 = vmatprep.mubr.msk.f32.mxu0 %vm592_vm0, %v593_v1  ;;  %485 = vmatpush3.bf16.msra.mxu0 %v484_v42 }
  0x3c   :  { %473 = vmatpush3.bf16.msra.mxu1 %v472_v29  ;;  %486 = vmatprep.subr.bf16.mxu0 %v591_v0 }
  0x3d   :  { %474 = vmatprep.subr.bf16.mxu1 %v591_v0 }
  0x3f   :  { %488 = vmatpush3.bf16.msra.mxu0 %v487_v44 }
  0x40   :  { %476 = vmatpush3.bf16.msra.mxu1 %v475_v32  ;;  %489 = vmatprep.subr.bf16.mxu0 %v591_v0 }
  0x41   :  { %477 = vmatprep.subr.bf16.mxu1 %v591_v0 }
  0x43   :  { %491 = vmatpush3.bf16.msra.mxu0 %v490_v47 }
  0x44   :  { %479 = vmatpush3.bf16.msra.mxu1 %v478_v35  ;;  %492 = vmatprep.subr.bf16.mxu0 %v591_v0 }
  0x45   :  { %480 = vmatprep.subr.bf16.mxu1 %v591_v0 }
  0x47   :  { %494 = vmatpush3.bf16.msra.mxu0 %v493_v50 }
  0x48   :  { %482 = vmatpush3.bf16.msra.mxu1 %v481_v38  ;;  %495 = vmatprep.subr.bf16.mxu0 %v591_v0 }
  0x4b   :  { %497 = vmatpush3.bf16.msra.mxu0 %v496_v53 }
  0x4c   :  { %498 = vmatprep.subr.bf16.mxu0 %v591_v0 }
  0x4f   :  { %500 = vmatpush3.bf16.msra.mxu0 %v499_v56 }
  0x50   :  { %501 = vmatprep.subr.bf16.mxu0 %v591_v0 }
  0x53   :  { %503 = vmatpush3.bf16.msra.mxu0 %v502_v59 }
  0x54   :  { %504 = vmatprep.subr.bf16.mxu0 %v591_v0 }
  0x57   :  { %506 = vmatpush3.bf16.msra.mxu0 %v505_v4 }
 0x10d   :  { %v151_v61 = vpop.f32.mrb[0].mxu0 }
 0x10e   :  { %v152_v62 = vadd.f32 %v151_v61, %v47_v60  ;;  %v376_v63 = vpop.f32.mrb[1].mxu0 }
 0x110   :  { %v155_v1 = vmax.f32 %v152_v62, 0.0 }
 0x112   :  { %410 = vmatmul.mubr.f32.vlgmr.msra.gmra.mrb[0].mxu1 %v155_v1 }
 0x1e5   :  { %v222_v5 = vpop.f32.mrb[0].mxu1 }
 0x1e6   :  { %v226_v6 = vmax.f32 %v222_v5, 0.0  ;;  %v411_v7 = vpop.f32.mrb[1].mxu1 }
 0x1e8   :  { %445 = vmatmul.mubr.f32.vlgmr.msra.gmra.mrb[2].mxu0 %v226_v6 }
 0x2bb   :  { %v293_v9 = vpop.f32.mrb[2].mxu0 }
 0x2bc   :  { %v294_v10 = vadd.f32 %v293_v9, %v80_v8  ;;  %v446_v0 = vpop.f32.mrb[3].mxu0 }
 0x2be   :  { %297 = vst [vmem:[#allocation7] sm:$0x1] %v294_v10 }
 0x2bf   :  { %570 = shalt.err (!%p567_p6)
}
 0x2c0   :  { %s571_s12 = scalar_lea.hbm %s678_s2, 16 }
 0x2c1   :  { %p572_p7 = scmp.ne.s32.totalorder %s678_s2, %s571_s12  ;;  %p575_p8 = scmp.lt.u32.totalorder %s571_s12, %s678_s2 }
 0x2c3   :  { %p577_p9 = pnand %p575_p8, %p572_p7 }
 0x2c5   :  { %580 = shalt.err (!%p577_p9)
}
 0x2c6   :  { %307 = dma.vmem_to_hbm [thread:$0]  %s305_s7, 16, %s678_s2, [#allocation4]  }
 0x2c7   :  { %585 = dma.done.wait [#allocation4], 16  }
 0x2c8   :  { %586 = vsyncadd [#allocation4], 4294967280 }
 0x2c9   :  { %311 = vsyncpa [#allocation3], 1 }
 0x2ca   :  { %312 = vsyncpa [#allocation6], 1 }
 0x2cb   :  { %313 = vsyncpa [#allocation4], 1 }

</bundles_post_ra>
